<compile_context>
chip_gen: v7x
topology: tpu7x:2x2x1
jax: 0.10.0
libtpu: 0.0.40
codegen_flags: <defaults>
</compile_context>

<pallas_src>
import functools

import jax
import jax.numpy as jnp
from jax.experimental import pallas as pl
from jax.experimental.pallas import tpu as pltpu


def _center_loss_kernel(tgt_ref, emb_ref, centers_ref, out_ref,
                        gather_buf, copy_sems, acc_ref, *, tile_b, scale):
    """One grid step processes a (tile_b, D) slice of the batch.

    tgt_ref     : SMEM (B,)  int32   -- scalar-prefetched class ids
    emb_ref     : VMEM (tile_b, D)   -- embedding tile for this grid step
    centers_ref : HBM  (C, D)        -- full centers table, never fully loaded
    out_ref     : SMEM (1, 1) f32    -- scalar loss
    gather_buf  : VMEM (tile_b, D)   -- gathered center rows for this tile
    copy_sems   : DMA semaphores, one per gathered row
    acc_ref     : VMEM (1, 1) f32    -- running sum of squared differences
    """
    i = pl.program_id(0)
    n = pl.num_programs(0)

    @pl.when(i == 0)
    def _():
        acc_ref[...] = jnp.zeros_like(acc_ref)

    # Data-dependent row gather: DMA each target's center row HBM -> VMEM.
    base = i * tile_b
    for r in range(tile_b):                       # static unroll; tile_b is small
        idx = tgt_ref[base + r]
        pltpu.make_async_copy(centers_ref.at[idx], gather_buf.at[r],
                              copy_sems.at[r]).start()
    for r in range(tile_b):
        idx = tgt_ref[base + r]
        pltpu.make_async_copy(centers_ref.at[idx], gather_buf.at[r],
                              copy_sems.at[r]).wait()

    diff = emb_ref[...] - gather_buf[...]
    acc_ref[...] += jnp.sum(diff * diff)          # per-tile partial sum of squares

    @pl.when(i == n - 1)
    def _():
        # sqrt on the vector path, reduce-to-scalar, single scaled SMEM store.
        out_ref[0, 0] = jnp.sum(jnp.sqrt(acc_ref[...])) * scale


def center_loss(embedding, target, centers, lamda):
    """embedding: (B, D) f32, target: (B,) int, centers: (C, D) f32 -> scalar f32."""
    b, d = embedding.shape
    c, d2 = centers.shape
    assert d == d2, "embedding_dim mismatch between embedding and centers"

    # Sublane-aligned batch tiles (8 rows) when possible; otherwise one full-batch tile.
    tile_b = 8 if b % 8 == 0 else b
    num_tiles = b // tile_b

    # Fold all epilogue constants into a single multiplier (lamda * 0.5 / B).
    scale = float(lamda) * 0.5 / float(b)

    kernel = functools.partial(_center_loss_kernel, tile_b=tile_b, scale=scale)

    out = pl.pallas_call(
        kernel,
        out_shape=jax.ShapeDtypeStruct((1, 1), jnp.float32),
        grid_spec=pltpu.PrefetchScalarGridSpec(
            num_scalar_prefetch=1,                # target ids -> SMEM, drive the gather
            grid=(num_tiles,),
            in_specs=[
                pl.BlockSpec((tile_b, d), lambda i, tgt: (i, 0)),  # embedding tiles
                pl.BlockSpec(memory_space=pl.ANY),                 # centers stay in HBM
            ],
            out_specs=pl.BlockSpec(memory_space=pltpu.SMEM),       # scalar loss in SMEM
            scratch_shapes=[
                pltpu.VMEM((tile_b, d), jnp.float32),              # gathered center rows
                pltpu.SemaphoreType.DMA((tile_b,)),                # per-row DMA sems
                pltpu.VMEM((1, 1), jnp.float32),                   # running sum of squares
            ],
        ),
        compiler_params=pltpu.CompilerParams(
            dimension_semantics=("arbitrary",)),   # accumulator carried across B tiles
    )(target.astype(jnp.int32), embedding, centers)
    return out[0, 0]


def _reference_center_loss(embedding, target, centers, lamda):
    expanded = jnp.take(centers, target, axis=0)
    dist = jnp.sqrt(jnp.sum((embedding - expanded) ** 2))
    return lamda * 0.5 * dist / embedding.shape[0]


if __name__ == "__main__":
    classes = 10
    embedding_dim = 32
    batch = 8
    lamda = 1.0

    key = jax.random.PRNGKey(0)
    k_centers, k_emb, k_tgt = jax.random.split(key, 3)

    # Deterministic parameter init (nn.Parameter(torch.randn(classes, embedding_dim))).
    centers = jax.random.normal(k_centers, (classes, embedding_dim), dtype=jnp.float32)
    embedding = jax.random.normal(k_emb, (batch, embedding_dim), dtype=jnp.float32)
    target = jax.random.randint(k_tgt, (batch,), 0, classes, dtype=jnp.int32)

    loss = center_loss(embedding, target, centers, lamda)
    loss = jax.block_until_ready(loss)

    ref = _reference_center_loss(embedding, target, centers, lamda)
    assert jnp.allclose(loss, ref, rtol=1e-5, atol=1e-5), (loss, ref)

    print("KERNEL_OK")
</pallas_src>

<mosaic_0001>
module attributes {stable_mosaic.version = 11 : i64} {
  func.func @_center_loss_kernel(%arg0: i32, %arg1: memref<8xi32, #tpu.memory_space<smem>>, %arg2: memref<8x32xf32, #tpu.memory_space<vmem>>, %arg3: memref<10x32xf32, #tpu.memory_space<any>>, %arg4: memref<1x1xf32, #tpu.memory_space<smem>>, %arg5: memref<8x32xf32, #tpu.memory_space<vmem>>, %arg6: memref<8x!tpu.dma_semaphore, #tpu.memory_space<semaphore_mem>>, %arg7: memref<1x1xf32, #tpu.memory_space<vmem>>) attributes {dimension_semantics = [#tpu.dimension_semantics<arbitrary>], iteration_bounds = array<i64: 1>, scalar_prefetch = 1 : i64, scratch_operands = 3 : i64, tpu.core_type = #tpu.core_type<tc>, window_params = [{transform_indices = @transform_0, window_bounds = array<i64: 8, 32>}, {}, {transform_indices = @transform_2, window_bounds = array<i64: 1, 1>}]} {
    %c0_i32 = arith.constant 0 : i32
    %0 = arith.cmpi eq, %arg0, %c0_i32 : i32
    %1 = arith.extui %0 : i1 to i32
    %c0_i32_0 = arith.constant 0 : i32
    %2 = arith.cmpi ne, %1, %c0_i32_0 : i32
    scf.if %2 {
      %cst_83 = arith.constant 0.000000e+00 : f32
      %163 = vector.broadcast %cst_83 : f32 to vector<1x1xf32>
      %c0_84 = arith.constant 0 : index
      %c0_85 = arith.constant 0 : index
      %164 = vector.load %arg7[%c0_84, %c0_85] : memref<1x1xf32, #tpu.memory_space<vmem>>, vector<1x1xf32>
      tpu.vector_store %arg7[%c0_84, %c0_85], %163 {strides = array<i32>} : memref<1x1xf32, #tpu.memory_space<vmem>>, vector<1x1xf32>,
    } else {
    }
    %c8_i32 = arith.constant 8 : i32
    %3 = arith.muli %arg0, %c8_i32 : i32
    %c0_i32_1 = arith.constant 0 : i32
    %4 = arith.addi %3, %c0_i32_1 : i32
    %5 = arith.index_cast %4 : i32 to index
    %6 = memref.load %arg1[%5] : memref<8xi32, #tpu.memory_space<smem>>
    %c0_i32_2 = arith.constant 0 : i32
    %c0_i32_3 = arith.constant 0 : i32
    %c0_i32_4 = arith.constant 0 : i32
    %7 = tpu.memref_slice %arg3[%6, %c0_i32_4] : memref<10x32xf32, #tpu.memory_space<any>> -> memref<1x32xf32, #tpu.memory_space<any>>
    %8 = tpu.memref_squeeze %7 : memref<1x32xf32, #tpu.memory_space<any>> -> memref<32xf32, #tpu.memory_space<any>>
    %c0_i32_5 = arith.constant 0 : i32
    %9 = tpu.memref_slice %arg5[%c0_i32_2, %c0_i32_5] : memref<8x32xf32, #tpu.memory_space<vmem>> -> memref<1x32xf32, #tpu.memory_space<vmem>>
    %10 = tpu.memref_squeeze %9 : memref<1x32xf32, #tpu.memory_space<vmem>> -> memref<32xf32, #tpu.memory_space<vmem>>
    %11 = tpu.memref_slice %arg6[%c0_i32_3] : memref<8x!tpu.dma_semaphore, #tpu.memory_space<semaphore_mem>> -> memref<1x!tpu.dma_semaphore, #tpu.memory_space<semaphore_mem>>
    %12 = tpu.memref_squeeze %11 : memref<1x!tpu.dma_semaphore, #tpu.memory_space<semaphore_mem>> -> memref<!tpu.dma_semaphore, #tpu.memory_space<semaphore_mem>>
    tpu.enqueue_dma source(%8 : memref<32xf32, #tpu.memory_space<any>>) target(%10 : memref<32xf32, #tpu.memory_space<vmem>>) target_semaphore(%12 : memref<!tpu.dma_semaphore, #tpu.memory_space<semaphore_mem>>)
    %c1_i32 = arith.constant 1 : i32
    %13 = arith.addi %3, %c1_i32 : i32
    %14 = arith.index_cast %13 : i32 to index
    %15 = memref.load %arg1[%14] : memref<8xi32, #tpu.memory_space<smem>>
    %c1_i32_6 = arith.constant 1 : i32
    %c1_i32_7 = arith.constant 1 : i32
    %c0_i32_8 = arith.constant 0 : i32
    %16 = tpu.memref_slice %arg3[%15, %c0_i32_8] : memref<10x32xf32, #tpu.memory_space<any>> -> memref<1x32xf32, #tpu.memory_space<any>>
    %17 = tpu.memref_squeeze %16 : memref<1x32xf32, #tpu.memory_space<any>> -> memref<32xf32, #tpu.memory_space<any>>
    %c0_i32_9 = arith.constant 0 : i32
    %18 = tpu.memref_slice %arg5[%c1_i32_6, %c0_i32_9] : memref<8x32xf32, #tpu.memory_space<vmem>> -> memref<1x32xf32, #tpu.memory_space<vmem>>
    %19 = tpu.memref_squeeze %18 : memref<1x32xf32, #tpu.memory_space<vmem>> -> memref<32xf32, #tpu.memory_space<vmem>>
    %20 = tpu.memref_slice %arg6[%c1_i32_7] : memref<8x!tpu.dma_semaphore, #tpu.memory_space<semaphore_mem>> -> memref<1x!tpu.dma_semaphore, #tpu.memory_space<semaphore_mem>>
    %21 = tpu.memref_squeeze %20 : memref<1x!tpu.dma_semaphore, #tpu.memory_space<semaphore_mem>> -> memref<!tpu.dma_semaphore, #tpu.memory_space<semaphore_mem>>
    tpu.enqueue_dma source(%17 : memref<32xf32, #tpu.memory_space<any>>) target(%19 : memref<32xf32, #tpu.memory_space<vmem>>) target_semaphore(%21 : memref<!tpu.dma_semaphore, #tpu.memory_space<semaphore_mem>>)
    %c2_i32 = arith.constant 2 : i32
    %22 = arith.addi %3, %c2_i32 : i32
    %23 = arith.index_cast %22 : i32 to index
    %24 = memref.load %arg1[%23] : memref<8xi32, #tpu.memory_space<smem>>
    %c2_i32_10 = arith.constant 2 : i32
    %c2_i32_11 = arith.constant 2 : i32
    %c0_i32_12 = arith.constant 0 : i32
    %25 = tpu.memref_slice %arg3[%24, %c0_i32_12] : memref<10x32xf32, #tpu.memory_space<any>> -> memref<1x32xf32, #tpu.memory_space<any>>
    %26 = tpu.memref_squeeze %25 : memref<1x32xf32, #tpu.memory_space<any>> -> memref<32xf32, #tpu.memory_space<any>>
    %c0_i32_13 = arith.constant 0 : i32
    %27 = tpu.memref_slice %arg5[%c2_i32_10, %c0_i32_13] : memref<8x32xf32, #tpu.memory_space<vmem>> -> memref<1x32xf32, #tpu.memory_space<vmem>>
    %28 = tpu.memref_squeeze %27 : memref<1x32xf32, #tpu.memory_space<vmem>> -> memref<32xf32, #tpu.memory_space<vmem>>
    %29 = tpu.memref_slice %arg6[%c2_i32_11] : memref<8x!tpu.dma_semaphore, #tpu.memory_space<semaphore_mem>> -> memref<1x!tpu.dma_semaphore, #tpu.memory_space<semaphore_mem>>
    %30 = tpu.memref_squeeze %29 : memref<1x!tpu.dma_semaphore, #tpu.memory_space<semaphore_mem>> -> memref<!tpu.dma_semaphore, #tpu.memory_space<semaphore_mem>>
    tpu.enqueue_dma source(%26 : memref<32xf32, #tpu.memory_space<any>>) target(%28 : memref<32xf32, #tpu.memory_space<vmem>>) target_semaphore(%30 : memref<!tpu.dma_semaphore, #tpu.memory_space<semaphore_mem>>)
    %c3_i32 = arith.constant 3 : i32
    %31 = arith.addi %3, %c3_i32 : i32
    %32 = arith.index_cast %31 : i32 to index
    %33 = memref.load %arg1[%32] : memref<8xi32, #tpu.memory_space<smem>>
    %c3_i32_14 = arith.constant 3 : i32
    %c3_i32_15 = arith.constant 3 : i32
    %c0_i32_16 = arith.constant 0 : i32
    %34 = tpu.memref_slice %arg3[%33, %c0_i32_16] : memref<10x32xf32, #tpu.memory_space<any>> -> memref<1x32xf32, #tpu.memory_space<any>>
    %35 = tpu.memref_squeeze %34 : memref<1x32xf32, #tpu.memory_space<any>> -> memref<32xf32, #tpu.memory_space<any>>
    %c0_i32_17 = arith.constant 0 : i32
    %36 = tpu.memref_slice %arg5[%c3_i32_14, %c0_i32_17] : memref<8x32xf32, #tpu.memory_space<vmem>> -> memref<1x32xf32, #tpu.memory_space<vmem>>
    %37 = tpu.memref_squeeze %36 : memref<1x32xf32, #tpu.memory_space<vmem>> -> memref<32xf32, #tpu.memory_space<vmem>>
    %38 = tpu.memref_slice %arg6[%c3_i32_15] : memref<8x!tpu.dma_semaphore, #tpu.memory_space<semaphore_mem>> -> memref<1x!tpu.dma_semaphore, #tpu.memory_space<semaphore_mem>>
    %39 = tpu.memref_squeeze %38 : memref<1x!tpu.dma_semaphore, #tpu.memory_space<semaphore_mem>> -> memref<!tpu.dma_semaphore, #tpu.memory_space<semaphore_mem>>
    tpu.enqueue_dma source(%35 : memref<32xf32, #tpu.memory_space<any>>) target(%37 : memref<32xf32, #tpu.memory_space<vmem>>) target_semaphore(%39 : memref<!tpu.dma_semaphore, #tpu.memory_space<semaphore_mem>>)
    %c4_i32 = arith.constant 4 : i32
    %40 = arith.addi %3, %c4_i32 : i32
    %41 = arith.index_cast %40 : i32 to index
    %42 = memref.load %arg1[%41] : memref<8xi32, #tpu.memory_space<smem>>
    %c4_i32_18 = arith.constant 4 : i32
    %c4_i32_19 = arith.constant 4 : i32
    %c0_i32_20 = arith.constant 0 : i32
    %43 = tpu.memref_slice %arg3[%42, %c0_i32_20] : memref<10x32xf32, #tpu.memory_space<any>> -> memref<1x32xf32, #tpu.memory_space<any>>
    %44 = tpu.memref_squeeze %43 : memref<1x32xf32, #tpu.memory_space<any>> -> memref<32xf32, #tpu.memory_space<any>>
    %c0_i32_21 = arith.constant 0 : i32
    %45 = tpu.memref_slice %arg5[%c4_i32_18, %c0_i32_21] : memref<8x32xf32, #tpu.memory_space<vmem>> -> memref<1x32xf32, #tpu.memory_space<vmem>>
    %46 = tpu.memref_squeeze %45 : memref<1x32xf32, #tpu.memory_space<vmem>> -> memref<32xf32, #tpu.memory_space<vmem>>
    %47 = tpu.memref_slice %arg6[%c4_i32_19] : memref<8x!tpu.dma_semaphore, #tpu.memory_space<semaphore_mem>> -> memref<1x!tpu.dma_semaphore, #tpu.memory_space<semaphore_mem>>
    %48 = tpu.memref_squeeze %47 : memref<1x!tpu.dma_semaphore, #tpu.memory_space<semaphore_mem>> -> memref<!tpu.dma_semaphore, #tpu.memory_space<semaphore_mem>>
    tpu.enqueue_dma source(%44 : memref<32xf32, #tpu.memory_space<any>>) target(%46 : memref<32xf32, #tpu.memory_space<vmem>>) target_semaphore(%48 : memref<!tpu.dma_semaphore, #tpu.memory_space<semaphore_mem>>)
    %c5_i32 = arith.constant 5 : i32
    %49 = arith.addi %3, %c5_i32 : i32
    %50 = arith.index_cast %49 : i32 to index
    %51 = memref.load %arg1[%50] : memref<8xi32, #tpu.memory_space<smem>>
    %c5_i32_22 = arith.constant 5 : i32
    %c5_i32_23 = arith.constant 5 : i32
    %c0_i32_24 = arith.constant 0 : i32
    %52 = tpu.memref_slice %arg3[%51, %c0_i32_24] : memref<10x32xf32, #tpu.memory_space<any>> -> memref<1x32xf32, #tpu.memory_space<any>>
    %53 = tpu.memref_squeeze %52 : memref<1x32xf32, #tpu.memory_space<any>> -> memref<32xf32, #tpu.memory_space<any>>
    %c0_i32_25 = arith.constant 0 : i32
    %54 = tpu.memref_slice %arg5[%c5_i32_22, %c0_i32_25] : memref<8x32xf32, #tpu.memory_space<vmem>> -> memref<1x32xf32, #tpu.memory_space<vmem>>
    %55 = tpu.memref_squeeze %54 : memref<1x32xf32, #tpu.memory_space<vmem>> -> memref<32xf32, #tpu.memory_space<vmem>>
    %56 = tpu.memref_slice %arg6[%c5_i32_23] : memref<8x!tpu.dma_semaphore, #tpu.memory_space<semaphore_mem>> -> memref<1x!tpu.dma_semaphore, #tpu.memory_space<semaphore_mem>>
    %57 = tpu.memref_squeeze %56 : memref<1x!tpu.dma_semaphore, #tpu.memory_space<semaphore_mem>> -> memref<!tpu.dma_semaphore, #tpu.memory_space<semaphore_mem>>
    tpu.enqueue_dma source(%53 : memref<32xf32, #tpu.memory_space<any>>) target(%55 : memref<32xf32, #tpu.memory_space<vmem>>) target_semaphore(%57 : memref<!tpu.dma_semaphore, #tpu.memory_space<semaphore_mem>>)
    %c6_i32 = arith.constant 6 : i32
    %58 = arith.addi %3, %c6_i32 : i32
    %59 = arith.index_cast %58 : i32 to index
    %60 = memref.load %arg1[%59] : memref<8xi32, #tpu.memory_space<smem>>
    %c6_i32_26 = arith.constant 6 : i32
    %c6_i32_27 = arith.constant 6 : i32
    %c0_i32_28 = arith.constant 0 : i32
    %61 = tpu.memref_slice %arg3[%60, %c0_i32_28] : memref<10x32xf32, #tpu.memory_space<any>> -> memref<1x32xf32, #tpu.memory_space<any>>
    %62 = tpu.memref_squeeze %61 : memref<1x32xf32, #tpu.memory_space<any>> -> memref<32xf32, #tpu.memory_space<any>>
    %c0_i32_29 = arith.constant 0 : i32
    %63 = tpu.memref_slice %arg5[%c6_i32_26, %c0_i32_29] : memref<8x32xf32, #tpu.memory_space<vmem>> -> memref<1x32xf32, #tpu.memory_space<vmem>>
    %64 = tpu.memref_squeeze %63 : memref<1x32xf32, #tpu.memory_space<vmem>> -> memref<32xf32, #tpu.memory_space<vmem>>
    %65 = tpu.memref_slice %arg6[%c6_i32_27] : memref<8x!tpu.dma_semaphore, #tpu.memory_space<semaphore_mem>> -> memref<1x!tpu.dma_semaphore, #tpu.memory_space<semaphore_mem>>
    %66 = tpu.memref_squeeze %65 : memref<1x!tpu.dma_semaphore, #tpu.memory_space<semaphore_mem>> -> memref<!tpu.dma_semaphore, #tpu.memory_space<semaphore_mem>>
    tpu.enqueue_dma source(%62 : memref<32xf32, #tpu.memory_space<any>>) target(%64 : memref<32xf32, #tpu.memory_space<vmem>>) target_semaphore(%66 : memref<!tpu.dma_semaphore, #tpu.memory_space<semaphore_mem>>)
    %c7_i32 = arith.constant 7 : i32
    %67 = arith.addi %3, %c7_i32 : i32
    %68 = arith.index_cast %67 : i32 to index
    %69 = memref.load %arg1[%68] : memref<8xi32, #tpu.memory_space<smem>>
    %c7_i32_30 = arith.constant 7 : i32
    %c7_i32_31 = arith.constant 7 : i32
    %c0_i32_32 = arith.constant 0 : i32
    %70 = tpu.memref_slice %arg3[%69, %c0_i32_32] : memref<10x32xf32, #tpu.memory_space<any>> -> memref<1x32xf32, #tpu.memory_space<any>>
    %71 = tpu.memref_squeeze %70 : memref<1x32xf32, #tpu.memory_space<any>> -> memref<32xf32, #tpu.memory_space<any>>
    %c0_i32_33 = arith.constant 0 : i32
    %72 = tpu.memref_slice %arg5[%c7_i32_30, %c0_i32_33] : memref<8x32xf32, #tpu.memory_space<vmem>> -> memref<1x32xf32, #tpu.memory_space<vmem>>
    %73 = tpu.memref_squeeze %72 : memref<1x32xf32, #tpu.memory_space<vmem>> -> memref<32xf32, #tpu.memory_space<vmem>>
    %74 = tpu.memref_slice %arg6[%c7_i32_31] : memref<8x!tpu.dma_semaphore, #tpu.memory_space<semaphore_mem>> -> memref<1x!tpu.dma_semaphore, #tpu.memory_space<semaphore_mem>>
    %75 = tpu.memref_squeeze %74 : memref<1x!tpu.dma_semaphore, #tpu.memory_space<semaphore_mem>> -> memref<!tpu.dma_semaphore, #tpu.memory_space<semaphore_mem>>
    tpu.enqueue_dma source(%71 : memref<32xf32, #tpu.memory_space<any>>) target(%73 : memref<32xf32, #tpu.memory_space<vmem>>) target_semaphore(%75 : memref<!tpu.dma_semaphore, #tpu.memory_space<semaphore_mem>>)
    %c0_i32_34 = arith.constant 0 : i32
    %76 = arith.addi %3, %c0_i32_34 : i32
    %77 = arith.index_cast %76 : i32 to index
    %78 = memref.load %arg1[%77] : memref<8xi32, #tpu.memory_space<smem>>
    %c0_i32_35 = arith.constant 0 : i32
    %c0_i32_36 = arith.constant 0 : i32
    %c0_i32_37 = arith.constant 0 : i32
    %79 = tpu.memref_slice %arg3[%78, %c0_i32_37] : memref<10x32xf32, #tpu.memory_space<any>> -> memref<1x32xf32, #tpu.memory_space<any>>
    %80 = tpu.memref_squeeze %79 : memref<1x32xf32, #tpu.memory_space<any>> -> memref<32xf32, #tpu.memory_space<any>>
    %c0_i32_38 = arith.constant 0 : i32
    %81 = tpu.memref_slice %arg5[%c0_i32_35, %c0_i32_38] : memref<8x32xf32, #tpu.memory_space<vmem>> -> memref<1x32xf32, #tpu.memory_space<vmem>>
    %82 = tpu.memref_squeeze %81 : memref<1x32xf32, #tpu.memory_space<vmem>> -> memref<32xf32, #tpu.memory_space<vmem>>
    %83 = tpu.memref_slice %arg6[%c0_i32_36] : memref<8x!tpu.dma_semaphore, #tpu.memory_space<semaphore_mem>> -> memref<1x!tpu.dma_semaphore, #tpu.memory_space<semaphore_mem>>
    %84 = tpu.memref_squeeze %83 : memref<1x!tpu.dma_semaphore, #tpu.memory_space<semaphore_mem>> -> memref<!tpu.dma_semaphore, #tpu.memory_space<semaphore_mem>>
    tpu.wait_dma2 semaphore(%84 : memref<!tpu.dma_semaphore, #tpu.memory_space<semaphore_mem>>) src(%80 : memref<32xf32, #tpu.memory_space<any>>) dst(%82 : memref<32xf32, #tpu.memory_space<vmem>>)
    %c1_i32_39 = arith.constant 1 : i32
    %85 = arith.addi %3, %c1_i32_39 : i32
    %86 = arith.index_cast %85 : i32 to index
    %87 = memref.load %arg1[%86] : memref<8xi32, #tpu.memory_space<smem>>
    %c1_i32_40 = arith.constant 1 : i32
    %c1_i32_41 = arith.constant 1 : i32
    %c0_i32_42 = arith.constant 0 : i32
    %88 = tpu.memref_slice %arg3[%87, %c0_i32_42] : memref<10x32xf32, #tpu.memory_space<any>> -> memref<1x32xf32, #tpu.memory_space<any>>
    %89 = tpu.memref_squeeze %88 : memref<1x32xf32, #tpu.memory_space<any>> -> memref<32xf32, #tpu.memory_space<any>>
    %c0_i32_43 = arith.constant 0 : i32
    %90 = tpu.memref_slice %arg5[%c1_i32_40, %c0_i32_43] : memref<8x32xf32, #tpu.memory_space<vmem>> -> memref<1x32xf32, #tpu.memory_space<vmem>>
    %91 = tpu.memref_squeeze %90 : memref<1x32xf32, #tpu.memory_space<vmem>> -> memref<32xf32, #tpu.memory_space<vmem>>
    %92 = tpu.memref_slice %arg6[%c1_i32_41] : memref<8x!tpu.dma_semaphore, #tpu.memory_space<semaphore_mem>> -> memref<1x!tpu.dma_semaphore, #tpu.memory_space<semaphore_mem>>
    %93 = tpu.memref_squeeze %92 : memref<1x!tpu.dma_semaphore, #tpu.memory_space<semaphore_mem>> -> memref<!tpu.dma_semaphore, #tpu.memory_space<semaphore_mem>>
    tpu.wait_dma2 semaphore(%93 : memref<!tpu.dma_semaphore, #tpu.memory_space<semaphore_mem>>) src(%89 : memref<32xf32, #tpu.memory_space<any>>) dst(%91 : memref<32xf32, #tpu.memory_space<vmem>>)
    %c2_i32_44 = arith.constant 2 : i32
    %94 = arith.addi %3, %c2_i32_44 : i32
    %95 = arith.index_cast %94 : i32 to index
    %96 = memref.load %arg1[%95] : memref<8xi32, #tpu.memory_space<smem>>
    %c2_i32_45 = arith.constant 2 : i32
    %c2_i32_46 = arith.constant 2 : i32
    %c0_i32_47 = arith.constant 0 : i32
    %97 = tpu.memref_slice %arg3[%96, %c0_i32_47] : memref<10x32xf32, #tpu.memory_space<any>> -> memref<1x32xf32, #tpu.memory_space<any>>
    %98 = tpu.memref_squeeze %97 : memref<1x32xf32, #tpu.memory_space<any>> -> memref<32xf32, #tpu.memory_space<any>>
    %c0_i32_48 = arith.constant 0 : i32
    %99 = tpu.memref_slice %arg5[%c2_i32_45, %c0_i32_48] : memref<8x32xf32, #tpu.memory_space<vmem>> -> memref<1x32xf32, #tpu.memory_space<vmem>>
    %100 = tpu.memref_squeeze %99 : memref<1x32xf32, #tpu.memory_space<vmem>> -> memref<32xf32, #tpu.memory_space<vmem>>
    %101 = tpu.memref_slice %arg6[%c2_i32_46] : memref<8x!tpu.dma_semaphore, #tpu.memory_space<semaphore_mem>> -> memref<1x!tpu.dma_semaphore, #tpu.memory_space<semaphore_mem>>
    %102 = tpu.memref_squeeze %101 : memref<1x!tpu.dma_semaphore, #tpu.memory_space<semaphore_mem>> -> memref<!tpu.dma_semaphore, #tpu.memory_space<semaphore_mem>>
    tpu.wait_dma2 semaphore(%102 : memref<!tpu.dma_semaphore, #tpu.memory_space<semaphore_mem>>) src(%98 : memref<32xf32, #tpu.memory_space<any>>) dst(%100 : memref<32xf32, #tpu.memory_space<vmem>>)
    %c3_i32_49 = arith.constant 3 : i32
    %103 = arith.addi %3, %c3_i32_49 : i32
    %104 = arith.index_cast %103 : i32 to index
    %105 = memref.load %arg1[%104] : memref<8xi32, #tpu.memory_space<smem>>
    %c3_i32_50 = arith.constant 3 : i32
    %c3_i32_51 = arith.constant 3 : i32
    %c0_i32_52 = arith.constant 0 : i32
    %106 = tpu.memref_slice %arg3[%105, %c0_i32_52] : memref<10x32xf32, #tpu.memory_space<any>> -> memref<1x32xf32, #tpu.memory_space<any>>
    %107 = tpu.memref_squeeze %106 : memref<1x32xf32, #tpu.memory_space<any>> -> memref<32xf32, #tpu.memory_space<any>>
    %c0_i32_53 = arith.constant 0 : i32
    %108 = tpu.memref_slice %arg5[%c3_i32_50, %c0_i32_53] : memref<8x32xf32, #tpu.memory_space<vmem>> -> memref<1x32xf32, #tpu.memory_space<vmem>>
    %109 = tpu.memref_squeeze %108 : memref<1x32xf32, #tpu.memory_space<vmem>> -> memref<32xf32, #tpu.memory_space<vmem>>
    %110 = tpu.memref_slice %arg6[%c3_i32_51] : memref<8x!tpu.dma_semaphore, #tpu.memory_space<semaphore_mem>> -> memref<1x!tpu.dma_semaphore, #tpu.memory_space<semaphore_mem>>
    %111 = tpu.memref_squeeze %110 : memref<1x!tpu.dma_semaphore, #tpu.memory_space<semaphore_mem>> -> memref<!tpu.dma_semaphore, #tpu.memory_space<semaphore_mem>>
    tpu.wait_dma2 semaphore(%111 : memref<!tpu.dma_semaphore, #tpu.memory_space<semaphore_mem>>) src(%107 : memref<32xf32, #tpu.memory_space<any>>) dst(%109 : memref<32xf32, #tpu.memory_space<vmem>>)
    %c4_i32_54 = arith.constant 4 : i32
    %112 = arith.addi %3, %c4_i32_54 : i32
    %113 = arith.index_cast %112 : i32 to index
    %114 = memref.load %arg1[%113] : memref<8xi32, #tpu.memory_space<smem>>
    %c4_i32_55 = arith.constant 4 : i32
    %c4_i32_56 = arith.constant 4 : i32
    %c0_i32_57 = arith.constant 0 : i32
    %115 = tpu.memref_slice %arg3[%114, %c0_i32_57] : memref<10x32xf32, #tpu.memory_space<any>> -> memref<1x32xf32, #tpu.memory_space<any>>
    %116 = tpu.memref_squeeze %115 : memref<1x32xf32, #tpu.memory_space<any>> -> memref<32xf32, #tpu.memory_space<any>>
    %c0_i32_58 = arith.constant 0 : i32
    %117 = tpu.memref_slice %arg5[%c4_i32_55, %c0_i32_58] : memref<8x32xf32, #tpu.memory_space<vmem>> -> memref<1x32xf32, #tpu.memory_space<vmem>>
    %118 = tpu.memref_squeeze %117 : memref<1x32xf32, #tpu.memory_space<vmem>> -> memref<32xf32, #tpu.memory_space<vmem>>
    %119 = tpu.memref_slice %arg6[%c4_i32_56] : memref<8x!tpu.dma_semaphore, #tpu.memory_space<semaphore_mem>> -> memref<1x!tpu.dma_semaphore, #tpu.memory_space<semaphore_mem>>
    %120 = tpu.memref_squeeze %119 : memref<1x!tpu.dma_semaphore, #tpu.memory_space<semaphore_mem>> -> memref<!tpu.dma_semaphore, #tpu.memory_space<semaphore_mem>>
    tpu.wait_dma2 semaphore(%120 : memref<!tpu.dma_semaphore, #tpu.memory_space<semaphore_mem>>) src(%116 : memref<32xf32, #tpu.memory_space<any>>) dst(%118 : memref<32xf32, #tpu.memory_space<vmem>>)
    %c5_i32_59 = arith.constant 5 : i32
    %121 = arith.addi %3, %c5_i32_59 : i32
    %122 = arith.index_cast %121 : i32 to index
    %123 = memref.load %arg1[%122] : memref<8xi32, #tpu.memory_space<smem>>
    %c5_i32_60 = arith.constant 5 : i32
    %c5_i32_61 = arith.constant 5 : i32
    %c0_i32_62 = arith.constant 0 : i32
    %124 = tpu.memref_slice %arg3[%123, %c0_i32_62] : memref<10x32xf32, #tpu.memory_space<any>> -> memref<1x32xf32, #tpu.memory_space<any>>
    %125 = tpu.memref_squeeze %124 : memref<1x32xf32, #tpu.memory_space<any>> -> memref<32xf32, #tpu.memory_space<any>>
    %c0_i32_63 = arith.constant 0 : i32
    %126 = tpu.memref_slice %arg5[%c5_i32_60, %c0_i32_63] : memref<8x32xf32, #tpu.memory_space<vmem>> -> memref<1x32xf32, #tpu.memory_space<vmem>>
    %127 = tpu.memref_squeeze %126 : memref<1x32xf32, #tpu.memory_space<vmem>> -> memref<32xf32, #tpu.memory_space<vmem>>
    %128 = tpu.memref_slice %arg6[%c5_i32_61] : memref<8x!tpu.dma_semaphore, #tpu.memory_space<semaphore_mem>> -> memref<1x!tpu.dma_semaphore, #tpu.memory_space<semaphore_mem>>
    %129 = tpu.memref_squeeze %128 : memref<1x!tpu.dma_semaphore, #tpu.memory_space<semaphore_mem>> -> memref<!tpu.dma_semaphore, #tpu.memory_space<semaphore_mem>>
    tpu.wait_dma2 semaphore(%129 : memref<!tpu.dma_semaphore, #tpu.memory_space<semaphore_mem>>) src(%125 : memref<32xf32, #tpu.memory_space<any>>) dst(%127 : memref<32xf32, #tpu.memory_space<vmem>>)
    %c6_i32_64 = arith.constant 6 : i32
    %130 = arith.addi %3, %c6_i32_64 : i32
    %131 = arith.index_cast %130 : i32 to index
    %132 = memref.load %arg1[%131] : memref<8xi32, #tpu.memory_space<smem>>
    %c6_i32_65 = arith.constant 6 : i32
    %c6_i32_66 = arith.constant 6 : i32
    %c0_i32_67 = arith.constant 0 : i32
    %133 = tpu.memref_slice %arg3[%132, %c0_i32_67] : memref<10x32xf32, #tpu.memory_space<any>> -> memref<1x32xf32, #tpu.memory_space<any>>
    %134 = tpu.memref_squeeze %133 : memref<1x32xf32, #tpu.memory_space<any>> -> memref<32xf32, #tpu.memory_space<any>>
    %c0_i32_68 = arith.constant 0 : i32
    %135 = tpu.memref_slice %arg5[%c6_i32_65, %c0_i32_68] : memref<8x32xf32, #tpu.memory_space<vmem>> -> memref<1x32xf32, #tpu.memory_space<vmem>>
    %136 = tpu.memref_squeeze %135 : memref<1x32xf32, #tpu.memory_space<vmem>> -> memref<32xf32, #tpu.memory_space<vmem>>
    %137 = tpu.memref_slice %arg6[%c6_i32_66] : memref<8x!tpu.dma_semaphore, #tpu.memory_space<semaphore_mem>> -> memref<1x!tpu.dma_semaphore, #tpu.memory_space<semaphore_mem>>
    %138 = tpu.memref_squeeze %137 : memref<1x!tpu.dma_semaphore, #tpu.memory_space<semaphore_mem>> -> memref<!tpu.dma_semaphore, #tpu.memory_space<semaphore_mem>>
    tpu.wait_dma2 semaphore(%138 : memref<!tpu.dma_semaphore, #tpu.memory_space<semaphore_mem>>) src(%134 : memref<32xf32, #tpu.memory_space<any>>) dst(%136 : memref<32xf32, #tpu.memory_space<vmem>>)
    %c7_i32_69 = arith.constant 7 : i32
    %139 = arith.addi %3, %c7_i32_69 : i32
    %140 = arith.index_cast %139 : i32 to index
    %141 = memref.load %arg1[%140] : memref<8xi32, #tpu.memory_space<smem>>
    %c7_i32_70 = arith.constant 7 : i32
    %c7_i32_71 = arith.constant 7 : i32
    %c0_i32_72 = arith.constant 0 : i32
    %142 = tpu.memref_slice %arg3[%141, %c0_i32_72] : memref<10x32xf32, #tpu.memory_space<any>> -> memref<1x32xf32, #tpu.memory_space<any>>
    %143 = tpu.memref_squeeze %142 : memref<1x32xf32, #tpu.memory_space<any>> -> memref<32xf32, #tpu.memory_space<any>>
    %c0_i32_73 = arith.constant 0 : i32
    %144 = tpu.memref_slice %arg5[%c7_i32_70, %c0_i32_73] : memref<8x32xf32, #tpu.memory_space<vmem>> -> memref<1x32xf32, #tpu.memory_space<vmem>>
    %145 = tpu.memref_squeeze %144 : memref<1x32xf32, #tpu.memory_space<vmem>> -> memref<32xf32, #tpu.memory_space<vmem>>
    %146 = tpu.memref_slice %arg6[%c7_i32_71] : memref<8x!tpu.dma_semaphore, #tpu.memory_space<semaphore_mem>> -> memref<1x!tpu.dma_semaphore, #tpu.memory_space<semaphore_mem>>
    %147 = tpu.memref_squeeze %146 : memref<1x!tpu.dma_semaphore, #tpu.memory_space<semaphore_mem>> -> memref<!tpu.dma_semaphore, #tpu.memory_space<semaphore_mem>>
    tpu.wait_dma2 semaphore(%147 : memref<!tpu.dma_semaphore, #tpu.memory_space<semaphore_mem>>) src(%143 : memref<32xf32, #tpu.memory_space<any>>) dst(%145 : memref<32xf32, #tpu.memory_space<vmem>>)
    %c0 = arith.constant 0 : index
    %c0_74 = arith.constant 0 : index
    %148 = vector.load %arg2[%c0, %c0_74] : memref<8x32xf32, #tpu.memory_space<vmem>>, vector<8x32xf32>
    %c0_75 = arith.constant 0 : index
    %c0_76 = arith.constant 0 : index
    %149 = vector.load %arg5[%c0_75, %c0_76] : memref<8x32xf32, #tpu.memory_space<vmem>>, vector<8x32xf32>
    %150 = arith.subf %148, %149 : vector<8x32xf32>
    %c0_77 = arith.constant 0 : index
    %c0_78 = arith.constant 0 : index
    %151 = vector.load %arg7[%c0_77, %c0_78] : memref<1x1xf32, #tpu.memory_space<vmem>>, vector<1x1xf32>
    %152 = arith.mulf %150, %150 : vector<8x32xf32>
    %153 = vector.shape_cast %152 : vector<8x32xf32> to vector<1x8x32xf32>
    %cst = arith.constant dense<0.000000e+00> : vector<1xf32>
    %154 = vector.multi_reduction <add>, %153, %cst [1, 2] : vector<1x8x32xf32> to vector<1xf32>
    %155 = vector.shape_cast %154 : vector<1xf32> to vector<1x1x1xf32>
    %156 = vector.extract %155[0, 0, 0] : f32 from vector<1x1x1xf32>
    %157 = vector.broadcast %156 : f32 to vector<1x1xf32>
    %158 = arith.addf %151, %157 : vector<1x1xf32>
    %c0_79 = arith.constant 0 : index
    %c0_80 = arith.constant 0 : index
    %159 = vector.load %arg7[%c0_79, %c0_80] : memref<1x1xf32, #tpu.memory_space<vmem>>, vector<1x1xf32>
    tpu.vector_store %arg7[%c0_79, %c0_80], %158 {strides = array<i32>} : memref<1x1xf32, #tpu.memory_space<vmem>>, vector<1x1xf32>,
    %c0_i32_81 = arith.constant 0 : i32
    %160 = arith.cmpi eq, %arg0, %c0_i32_81 : i32
    %161 = arith.extui %160 : i1 to i32
    %c0_i32_82 = arith.constant 0 : i32
    %162 = arith.cmpi ne, %161, %c0_i32_82 : i32
    scf.if %162 {
      %c0_83 = arith.constant 0 : index
      %c0_84 = arith.constant 0 : index
      %163 = vector.load %arg7[%c0_83, %c0_84] : memref<1x1xf32, #tpu.memory_space<vmem>>, vector<1x1xf32>
      %164 = math.sqrt %163 : vector<1x1xf32>
      %165 = vector.shape_cast %164 : vector<1x1xf32> to vector<1x1x1xf32>
      %cst_85 = arith.constant dense<0.000000e+00> : vector<1xf32>
      %166 = vector.multi_reduction <add>, %165, %cst_85 [1, 2] : vector<1x1x1xf32> to vector<1xf32>
      %167 = vector.shape_cast %166 : vector<1xf32> to vector<1x1x1xf32>
      %168 = vector.extract %167[0, 0, 0] : f32 from vector<1x1x1xf32>
      %cst_86 = arith.constant 6.250000e-02 : f32
      %169 = arith.mulf %168, %cst_86 : f32
      %c0_87 = arith.constant 0 : index
      %c0_88 = arith.constant 0 : index
      %170 = memref.load %arg4[%c0_87, %c0_88] : memref<1x1xf32, #tpu.memory_space<smem>>
      memref.store %169, %arg4[%c0_87, %c0_88] : memref<1x1xf32, #tpu.memory_space<smem>>
    } else {
    }
    return
  }
  func.func @transform_0(%arg0: i32, %arg1: memref<8xi32, #tpu.memory_space<smem>>) -> (i32, i32) {
    %c0_i32 = arith.constant 0 : i32
    %c0_i32_0 = arith.constant 0 : i32
    return %arg0, %c0_i32 : i32, i32
  }
  func.func @transform_2(%arg0: i32, %arg1: memref<8xi32, #tpu.memory_space<smem>>) -> (i32, i32) {
    %c0_i32 = arith.constant 0 : i32
    %c0_i32_0 = arith.constant 0 : i32
    %c0_i32_1 = arith.constant 0 : i32
    return %c0_i32, %c0_i32_0 : i32, i32
  }
}

</mosaic_0001>

<bundles_post_ra>
// kernel: tpu_custom_call.1
= control target key start
LH: loop header
LB: loop body
LE: loop exit
PB: predicated region body
PF: predicated region fallthrough
CT: control target
= control target key end

     0   :  { %s810_s0 = inlined_call_operand.hbm [shape: s32[8], index: 0, kind: input, shape index: {}]   ;;  %s811_s1 = inlined_call_operand.hbm [shape: f32[8,32], index: 1, kind: input, shape index: {}]   ;;  %s812_s2 = inlined_call_operand.hbm [shape: f32[10,32], index: 2, kind: input, shape index: {}]   ;;  %s813_s3 = inlined_call_operand.hbm [shape: f32[1,1], index: 3, kind: output, shape index: {}]  }
   0x1   :  { %s353_s14 = scalar_lea.hbm %s810_s0, 16 }
   0x2   :  { %p354_p0 = scmp.ne.s32.totalorder %s810_s0, %s353_s14  ;;  %p357_p1 = scmp.lt.u32.totalorder %s353_s14, %s810_s0 }
   0x4   :  { %p359_p2 = pnand %p357_p1, %p354_p0 }
   0x6   :  { %362 = shalt.err (!%p359_p2)  }
   0x7   :  { %s609_s19 = smov [#allocation6]  }
   0x8   :  { %9 = dma.hbm_to_smem %s810_s0, 16, %s609_s19, [#allocation5] }
   0x9   :  { %587 = dma.done.wait [#allocation5], 16 }
   0xa   :  { %588 = vsyncadd [#allocation5], 4294967280 }
   0xb   :  { %11 = sfence }
   0xc   :  { %12 = vsyncpa [#allocation8], 0 }
   0xd   :  { %13 = vsyncpa [#allocation9], 0  ;;  %s610_s22 = smov [#allocation7]   ;;  %s363_s26 = scalar_lea.hbm %s811_s1, 128 }
   0xe   :  { %s20_s23 = sshll.u32 %s610_s22, 4  ;;  %p364_p3 = scmp.ne.s32.totalorder %s811_s1, %s363_s26  ;;  %s21_s23 = int_to_ptr.vmem [resolvable:$true] %s20_s23 }
   0xf   :  { %p367_p4 = scmp.lt.u32.totalorder %s363_s26, %s811_s1 }
  0x11   :  { %p369_p5 = pnand %p367_p4, %p364_p3 }
  0x13   :  { %372 = shalt.err (!%p369_p5)
}
  0x14   :  { %s373_s0 = scalar_lea.vmem %s21_s23, 128  ;;  %p378_p7 = scmp.lt.s32.totalorder %s21_s23, %s21_s23 }
  0x15   :  { %p374_p6 = scmp.ne.s32.totalorder %s21_s23, %s373_s0  ;;  %p379_p8 = scmp.lt.s32.totalorder %s373_s0, %s373_s0 }
  0x17   :  { %p380_p9 = por %p379_p8, %p378_p7 }
  0x19   :  { %p381_p10 = pnand %p380_p9, %p374_p6 }
  0x1b   :  { %384 = shalt.err (!%p381_p10)
}
  0x1c   :  { %23 = dma.hbm_to_vmem [thread:$0]  %s811_s1, 128, %s21_s23, [#allocation8]  }
  0x1d   :  { %589 = dma.done.wait [#allocation8], 128  }
  0x1e   :  { %590 = vsyncadd [#allocation8], 4294967168  ;;  %vm31_vm0 = vcmask 0   ;;  %s34_s6 = sld [smem:[#allocation6]]  ;;  %s611_s7 = smov [#allocation2]   ;;  %v612_v0 = vmov 0.0  }
  0x1f   :  { %s44_s8 = sshll.u32 %s611_s7, 4  ;;  %32 = vst.msk [vmem:[#allocation4] sm:$0x1] %vm31_vm0, %v612_v0  ;;  %s668_s9 = sld [smem:[#allocation6 + $0x1]]  ;;  %s666_s8 = int_to_ptr.vmem [resolvable:$true] %s44_s8 }
  0x20   :  { %s613_s10 = smov [#allocation2 + $0x1]   ;;  %s670_s12 = sld [smem:[#allocation6 + $0x2]] }
  0x21   :  { %s61_s11 = sshll.u32 %s613_s10, 4  ;;  %s614_s1 = smov [#allocation2 + $0x2]   ;;  %s672_s11 = int_to_ptr.vmem [resolvable:$true] %s61_s11 }
  0x22   :  { %s78_s13 = sshll.u32 %s614_s1, 4  ;;  %s674_s14 = sld [smem:[#allocation6 + $0x3]]  ;;  %s676_s13 = int_to_ptr.vmem [resolvable:$true] %s78_s13 }
  0x23   :  { %s615_s16 = smov [#allocation2 + $0x3]   ;;  %s687_s25 = scalar_lea.hbm %s812_s2, 256 }
  0x24   :  { %s312_s15 = sshll.u32 %s34_s6, 4  ;;  %s678_s17 = sshll.u32 %s615_s16, 4  ;;  %s96_s17 = int_to_ptr.vmem [resolvable:$true] %s678_s17 }
  0x25   :  { %s36_s20 = scalar_lea.hbm %s812_s2, %s312_s15  ;;  %s314_s21 = sshll.u32 %s668_s9, 4 }
  0x26   :  { %s385_s22 = scalar_lea.hbm %s36_s20, 16  ;;  %p388_p12 = scmp.lt.u32.totalorder %s36_s20, %s812_s2 }
  0x27   :  { %p386_p11 = scmp.ne.s32.totalorder %s36_s20, %s385_s22  ;;  %p389_p13 = scmp.lt.u32.totalorder %s687_s25, %s385_s22 }
  0x28   :  { %p391_p1 = scmp.lt.u32.totalorder %s385_s22, %s36_s20 }
  0x29   :  { %p390_p0 = por %p389_p13, %p388_p12 }
  0x2b   :  { %p392_p2 = por %p391_p1, %p390_p0 }
  0x2d   :  { %p393_p3 = pnand %p392_p2, %p386_p11 }
  0x2f   :  { %396 = shalt.err (!%p393_p3)  }
  0x30   :  { %s397_s28 = scalar_lea.vmem %s666_s8, 16  ;;  %s696_s29 = scalar_lea.vmem %s666_s8, 128 }
  0x31   :  { %p398_p4 = scmp.ne.s32.totalorder %s666_s8, %s397_s28  ;;  %p402_p5 = scmp.lt.s32.totalorder %s666_s8, %s666_s8 }
  0x32   :  { %p403_p6 = scmp.lt.s32.totalorder %s696_s29, %s397_s28 }
  0x34   :  { %p404_p7 = por %p403_p6, %p402_p5 }
  0x36   :  { %p405_p8 = pnand %p404_p7, %p398_p4 }
  0x38   :  { %408 = shalt.err (!%p405_p8)  }
  0x39   :  { %47 = dma.hbm_to_vmem [thread:$0]  %s36_s20, 16, %s666_s8, [#allocation3] }
  0x3a   :  { %s51_s4 = scalar_lea.hbm %s812_s2, %s314_s21  ;;  %s316_s5 = sshll.u32 %s670_s12, 4 }
  0x3b   :  { %s409_s6 = scalar_lea.hbm %s51_s4, 16  ;;  %p412_p10 = scmp.lt.u32.totalorder %s51_s4, %s812_s2 }
  0x3c   :  { %p410_p9 = scmp.ne.s32.totalorder %s51_s4, %s409_s6  ;;  %p413_p11 = scmp.lt.u32.totalorder %s687_s25, %s409_s6 }
  0x3d   :  { %p415_p13 = scmp.lt.u32.totalorder %s409_s6, %s51_s4 }
  0x3e   :  { %p414_p12 = por %p413_p11, %p412_p10 }
  0x40   :  { %p416_p0 = por %p415_p13, %p414_p12 }
  0x42   :  { %p417_p1 = pnand %p416_p0, %p410_p9 }
  0x44   :  { %420 = shalt.err (!%p417_p1)  }
  0x45   :  { %s421_s10 = scalar_lea.vmem %s672_s11, 16  ;;  %p426_p3 = scmp.lt.s32.totalorder %s672_s11, %s666_s8 }
  0x46   :  { %p422_p2 = scmp.ne.s32.totalorder %s672_s11, %s421_s10  ;;  %p427_p4 = scmp.lt.s32.totalorder %s696_s29, %s421_s10 }
  0x48   :  { %p428_p5 = por %p427_p4, %p426_p3 }
  0x4a   :  { %p429_p6 = pnand %p428_p5, %p422_p2 }
  0x4c   :  { %432 = shalt.err (!%p429_p6)  }
  0x4d   :  { %64 = dma.hbm_to_vmem [thread:$0]  %s51_s4, 16, %s672_s11, [#allocation3 + $0x1] }
  0x4e   :  { %s68_s15 = scalar_lea.hbm %s812_s2, %s316_s5  ;;  %s318_s16 = sshll.u32 %s674_s14, 4 }
  0x4f   :  { %s433_s18 = scalar_lea.hbm %s68_s15, 16  ;;  %p436_p8 = scmp.lt.u32.totalorder %s68_s15, %s812_s2 }
  0x50   :  { %p434_p7 = scmp.ne.s32.totalorder %s68_s15, %s433_s18  ;;  %p437_p9 = scmp.lt.u32.totalorder %s687_s25, %s433_s18 }
  0x51   :  { %p439_p11 = scmp.lt.u32.totalorder %s433_s18, %s68_s15 }
  0x52   :  { %p438_p10 = por %p437_p9, %p436_p8 }
  0x54   :  { %p440_p12 = por %p439_p11, %p438_p10 }
  0x56   :  { %p441_p13 = pnand %p440_p12, %p434_p7 }
  0x58   :  { %444 = shalt.err (!%p441_p13)  }
  0x59   :  { %s445_s11 = scalar_lea.vmem %s676_s13, 16  ;;  %p450_p1 = scmp.lt.s32.totalorder %s676_s13, %s666_s8 }
  0x5a   :  { %p446_p0 = scmp.ne.s32.totalorder %s676_s13, %s445_s11  ;;  %p451_p2 = scmp.lt.s32.totalorder %s696_s29, %s445_s11 }
  0x5c   :  { %p452_p3 = por %p451_p2, %p450_p1 }
  0x5e   :  { %p453_p4 = pnand %p452_p3, %p446_p0 }
  0x60   :  { %456 = shalt.err (!%p453_p4)  }
  0x61   :  { %81 = dma.hbm_to_vmem [thread:$0]  %s68_s15, 16, %s676_s13, [#allocation3 + $0x2] }
  0x62   :  { %s85_s22 = scalar_lea.hbm %s812_s2, %s318_s16 }
  0x63   :  { %s457_s23 = scalar_lea.hbm %s85_s22, 16  ;;  %p460_p6 = scmp.lt.u32.totalorder %s85_s22, %s812_s2 }
  0x64   :  { %p458_p5 = scmp.ne.s32.totalorder %s85_s22, %s457_s23  ;;  %p461_p7 = scmp.lt.u32.totalorder %s687_s25, %s457_s23 }
  0x65   :  { %p463_p9 = scmp.lt.u32.totalorder %s457_s23, %s85_s22 }
  0x66   :  { %p462_p8 = por %p461_p7, %p460_p6 }
  0x68   :  { %p464_p10 = por %p463_p9, %p462_p8 }
  0x6a   :  { %p465_p11 = pnand %p464_p10, %p458_p5 }
  0x6c   :  { %468 = shalt.err (!%p465_p11)  }
  0x6d   :  { %s469_s27 = scalar_lea.vmem %s96_s17, 16  ;;  %p474_p13 = scmp.lt.s32.totalorder %s96_s17, %s666_s8 }
  0x6e   :  { %p470_p12 = scmp.ne.s32.totalorder %s96_s17, %s469_s27  ;;  %p475_p0 = scmp.lt.s32.totalorder %s696_s29, %s469_s27 }
  0x70   :  { %p476_p1 = por %p475_p0, %p474_p13 }
  0x72   :  { %p477_p2 = pnand %p476_p1, %p470_p12 }
  0x74   :  { %480 = shalt.err (!%p477_p2)  }
  0x75   :  { %98 = dma.hbm_to_vmem [thread:$0]  %s85_s22, 16, %s96_s17, [#allocation3 + $0x3] }
  0x76   :  { %s319_s13 = sld [smem:[#allocation6 + $0x4]]  ;;  %s616_s28 = smov [#allocation2 + $0x4]  }
  0x77   :  { %s112_s30 = sshll.u32 %s616_s28, 4  ;;  %s740_s0 = sld [smem:[#allocation6 + $0x5]]  ;;  %s113_s30 = int_to_ptr.vmem [resolvable:$true] %s112_s30 }
  0x78   :  { %s617_s4 = smov [#allocation2 + $0x5]   ;;  %s742_s6 = sld [smem:[#allocation6 + $0x6]] }
  0x79   :  { %s129_s5 = sshll.u32 %s617_s4, 4  ;;  %s618_s7 = smov [#allocation2 + $0x6]   ;;  %s744_s5 = int_to_ptr.vmem [resolvable:$true] %s129_s5 }
  0x7a   :  { %s146_s9 = sshll.u32 %s618_s7, 4  ;;  %s746_s10 = sld [smem:[#allocation6 + $0x7]]  ;;  %s748_s9 = int_to_ptr.vmem [resolvable:$true] %s146_s9 }
  0x7c   :  { %s320_s12 = sshll.u32 %s319_s13, 4 }
  0x7d   :  { %s102_s15 = scalar_lea.hbm %s812_s2, %s320_s12  ;;  %s322_s16 = sshll.u32 %s740_s0, 4 }
  0x7e   :  { %s481_s18 = scalar_lea.hbm %s102_s15, 16  ;;  %p484_p4 = scmp.lt.u32.totalorder %s102_s15, %s812_s2 }
  0x7f   :  { %p482_p3 = scmp.ne.s32.totalorder %s102_s15, %s481_s18  ;;  %p485_p5 = scmp.lt.u32.totalorder %s687_s25, %s481_s18 }
  0x80   :  { %p487_p7 = scmp.lt.u32.totalorder %s481_s18, %s102_s15 }
  0x81   :  { %p486_p6 = por %p485_p5, %p484_p4 }
  0x83   :  { %p488_p8 = por %p487_p7, %p486_p6 }
  0x85   :  { %p489_p9 = pnand %p488_p8, %p482_p3 }
  0x87   :  { %492 = shalt.err (!%p489_p9)  }
  0x88   :  { %s493_s11 = scalar_lea.vmem %s113_s30, 16  ;;  %p498_p11 = scmp.lt.s32.totalorder %s113_s30, %s666_s8 }
  0x89   :  { %p494_p10 = scmp.ne.s32.totalorder %s113_s30, %s493_s11  ;;  %p499_p12 = scmp.lt.s32.totalorder %s696_s29, %s493_s11 }
  0x8b   :  { %p500_p13 = por %p499_p12, %p498_p11 }
  0x8d   :  { %p501_p0 = pnand %p500_p13, %p494_p10 }
  0x8f   :  { %504 = shalt.err (!%p501_p0)  }
  0x90   :  { %115 = dma.hbm_to_vmem [thread:$0]  %s102_s15, 16, %s113_s30, [#allocation3 + $0x4] }
  0x91   :  { %s119_s22 = scalar_lea.hbm %s812_s2, %s322_s16  ;;  %s324_s23 = sshll.u32 %s742_s6, 4 }
  0x92   :  { %s505_s24 = scalar_lea.hbm %s119_s22, 16  ;;  %p508_p2 = scmp.lt.u32.totalorder %s119_s22, %s812_s2 }
  0x93   :  { %p506_p1 = scmp.ne.s32.totalorder %s119_s22, %s505_s24  ;;  %p509_p3 = scmp.lt.u32.totalorder %s687_s25, %s505_s24 }
  0x94   :  { %p511_p5 = scmp.lt.u32.totalorder %s505_s24, %s119_s22 }
  0x95   :  { %p510_p4 = por %p509_p3, %p508_p2 }
  0x97   :  { %p512_p6 = por %p511_p5, %p510_p4 }
  0x99   :  { %p513_p7 = pnand %p512_p6, %p506_p1 }
  0x9b   :  { %516 = shalt.err (!%p513_p7)  }
  0x9c   :  { %s517_s13 = scalar_lea.vmem %s744_s5, 16  ;;  %p522_p9 = scmp.lt.s32.totalorder %s744_s5, %s666_s8 }
  0x9d   :  { %p518_p8 = scmp.ne.s32.totalorder %s744_s5, %s517_s13  ;;  %p523_p10 = scmp.lt.s32.totalorder %s696_s29, %s517_s13 }
  0x9f   :  { %p524_p11 = por %p523_p10, %p522_p9 }
  0xa1   :  { %p525_p12 = pnand %p524_p11, %p518_p8 }
  0xa3   :  { %528 = shalt.err (!%p525_p12)  }
  0xa4   :  { %132 = dma.hbm_to_vmem [thread:$0]  %s119_s22, 16, %s744_s5, [#allocation3 + $0x5] }
  0xa5   :  { %s136_s0 = scalar_lea.hbm %s812_s2, %s324_s23  ;;  %s326_s4 = sshll.u32 %s746_s10, 4 }
  0xa6   :  { %s529_s6 = scalar_lea.hbm %s136_s0, 16  ;;  %p532_p0 = scmp.lt.u32.totalorder %s136_s0, %s812_s2 }
  0xa7   :  { %p530_p13 = scmp.ne.s32.totalorder %s136_s0, %s529_s6  ;;  %p533_p1 = scmp.lt.u32.totalorder %s687_s25, %s529_s6 }
  0xa8   :  { %p535_p3 = scmp.lt.u32.totalorder %s529_s6, %s136_s0 }
  0xa9   :  { %p534_p2 = por %p533_p1, %p532_p0 }
  0xab   :  { %p536_p4 = por %p535_p3, %p534_p2 }
  0xad   :  { %p537_p5 = pnand %p536_p4, %p530_p13 }
  0xaf   :  { %540 = shalt.err (!%p537_p5)  }
  0xb0   :  { %s541_s5 = scalar_lea.vmem %s748_s9, 16  ;;  %p546_p7 = scmp.lt.s32.totalorder %s748_s9, %s666_s8 }
  0xb1   :  { %p542_p6 = scmp.ne.s32.totalorder %s748_s9, %s541_s5  ;;  %p547_p8 = scmp.lt.s32.totalorder %s696_s29, %s541_s5 }
  0xb3   :  { %p548_p9 = por %p547_p8, %p546_p7 }
  0xb5   :  { %p549_p10 = pnand %p548_p9, %p542_p6 }
  0xb7   :  { %552 = shalt.err (!%p549_p10)  }
  0xb8   :  { %149 = dma.hbm_to_vmem [thread:$0]  %s136_s0, 16, %s748_s9, [#allocation3 + $0x6] }
  0xb9   :  { %s153_s1 = scalar_lea.hbm %s812_s2, %s326_s4  ;;  %s619_s15 = smov [#allocation2 + $0x7]  }
  0xba   :  { %s163_s16 = sshll.u32 %s619_s15, 4  ;;  %s553_s18 = scalar_lea.hbm %s153_s1, 16  ;;  %s164_s16 = int_to_ptr.vmem [resolvable:$true] %s163_s16 }
  0xbb   :  { %p554_p11 = scmp.ne.s32.totalorder %s153_s1, %s553_s18  ;;  %p556_p12 = scmp.lt.u32.totalorder %s153_s1, %s812_s2 }
  0xbc   :  { %p557_p13 = scmp.lt.u32.totalorder %s687_s25, %s553_s18  ;;  %p559_p1 = scmp.lt.u32.totalorder %s553_s18, %s153_s1 }
  0xbe   :  { %p558_p0 = por %p557_p13, %p556_p12 }
  0xc0   :  { %p560_p2 = por %p559_p1, %p558_p0 }
  0xc2   :  { %p561_p3 = pnand %p560_p2, %p554_p11 }
  0xc4   :  { %564 = shalt.err (!%p561_p3)  }
  0xc5   :  { %s565_s9 = scalar_lea.vmem %s164_s16, 16  ;;  %p570_p5 = scmp.lt.s32.totalorder %s164_s16, %s666_s8 }
  0xc6   :  { %p566_p4 = scmp.ne.s32.totalorder %s164_s16, %s565_s9  ;;  %p571_p6 = scmp.lt.s32.totalorder %s696_s29, %s565_s9 }
  0xc8   :  { %p572_p7 = por %p571_p6, %p570_p5 }
  0xca   :  { %p573_p8 = pnand %p572_p7, %p566_p4 }
  0xcc   :  { %576 = shalt.err (!%p573_p8)  }
  0xcd   :  { %166 = dma.hbm_to_vmem [thread:$0]  %s153_s1, 16, %s164_s16, [#allocation3 + $0x7] }
  0xce   :  { %591 = dma.done.wait [#allocation3], 16 }
  0xcf   :  { %592 = vsyncadd [#allocation3], 4294967280 }
  0xd0   :  { %593 = dma.done.wait [#allocation3 + $0x1], 16 }
  0xd1   :  { %594 = vsyncadd [#allocation3 + $0x1], 4294967280 }
  0xd2   :  { %595 = dma.done.wait [#allocation3 + $0x2], 16 }
  0xd3   :  { %596 = vsyncadd [#allocation3 + $0x2], 4294967280 }
  0xd4   :  { %597 = dma.done.wait [#allocation3 + $0x3], 16 }
  0xd5   :  { %598 = vsyncadd [#allocation3 + $0x3], 4294967280 }
  0xd6   :  { %599 = dma.done.wait [#allocation3 + $0x4], 16 }
  0xd7   :  { %600 = vsyncadd [#allocation3 + $0x4], 4294967280 }
  0xd8   :  { %601 = dma.done.wait [#allocation3 + $0x5], 16 }
  0xd9   :  { %602 = vsyncadd [#allocation3 + $0x5], 4294967280 }
  0xda   :  { %603 = dma.done.wait [#allocation3 + $0x6], 16 }
  0xdb   :  { %604 = vsyncadd [#allocation3 + $0x6], 4294967280 }
  0xdc   :  { %605 = dma.done.wait [#allocation3 + $0x7], 16 }
  0xdd   :  { %606 = vsyncadd [#allocation3 + $0x7], 4294967280  ;;  %v191_v1 = vld [vmem:[#allocation7] sm:$0xff]  ;;  %v192_v2 = vld [vmem:[#allocation2] sm:$0xff]  ;;  %vm196_vm1 = vcmask 261120   ;;  %s577_s14 = scalar_lea.hbm %s813_s3, 16 }
  0xde   :  { %v193_v3 = vsub.f32 %v191_v1, %v192_v2  ;;  %v194_v13 = vld [vmem:[#allocation4] sm:$0x1]  ;;  %p578_p9 = scmp.ne.s32.totalorder %s813_s3, %s577_s14  ;;  %p581_p10 = scmp.lt.u32.totalorder %s577_s14, %s813_s3 }
  0xe0   :  { %v195_v4 = vmul.f32 %v193_v3, %v193_v3  ;;  %p583_p11 = pnand %p581_p10, %p578_p9 }
  0xe2   :  { %v197_v5 = vsel %vm196_vm1, %v195_v4, 0.0 }
  0xe3   :  { %198 = vadd.xlane.f32.xlu0 %v197_v5 }
 0x170   :  { %v199_v6 = vpop.xlane.xlu0 %198 }
 0x171   :  { %v200_v7 = vrot.slane %v199_v6, 4 }
 0x173   :  { %v201_v8 = vadd.f32 %v200_v7, %v199_v6 }
 0x175   :  { %v202_v9 = vrot.slane %v201_v8, 2 }
 0x177   :  { %v203_v10 = vadd.f32 %v202_v9, %v201_v8 }
 0x179   :  { %v204_v11 = vrot.slane %v203_v10, 1 }
 0x17b   :  { %v205_v12 = vadd.f32 %v204_v11, %v203_v10 }
 0x17d   :  { %335 = vpush %v205_v12 }
 0x1ae   :  { %s336_s2 = spop %335 }
 0x1af   :  { %v207_v14 = vstv %s336_s2 }
 0x1b0   :  { %v208_v15 = vadd.f32 %v207_v14, %v194_v13 }
 0x1b2   :  { %210 = vst.msk [vmem:[#allocation4] sm:$0x1] %vm31_vm0, %v208_v15 }
 0x1b9   :  { %v214_v16 = vld [vmem:[#allocation4] sm:$0x1] }
 0x1ba   :  { %351 = vrsqrt.f32 %v214_v16  ;;  %vm217_vm2 = vcmp.eq.f32.partialorder %v214_v16, inf  ;;  %v220_v19 = vand.u32 2147483648, %v214_v16  ;;  %vm219_vm3 = vcmp.eq.f32.partialorder %v214_v16, 0.0 }
 0x1c4   :  { %v352_v17 = vpop.eup %351 }
 0x1c5   :  { %v216_v18 = vmul.f32 %v352_v17, %v214_v16 }
 0x1c7   :  { %v218_v20 = vsel %vm217_vm2, %v214_v16, %v216_v18 }
 0x1c8   :  { %v221_v21 = vsel %vm219_vm3, %v220_v19, %v218_v20 }
 0x1c9   :  { %337 = vpush %v221_v21 }
 0x1fa   :  { %s338_s8 = spop %337 }
 0x1fb   :  { %s224_s25 = smul.f32 0.0625, %s338_s8 }
 0x1fd   :  { %226 = sst [smem:[#allocation10]] %s224_s25 }
 0x1fe   :  { %586 = shalt.err (!%p583_p11)
}
 0x1ff   :  { %s620_s26 = smov [#allocation10]  }
 0x200   :  { %234 = dma.smem_to_hbm %s620_s26, 16, %s813_s3, [#allocation9]  }
 0x201   :  { %607 = dma.done.wait [#allocation9], 16  }
 0x202   :  { %608 = vsyncadd [#allocation9], 4294967280 }
 0x203   :  { %238 = sfence }
 0x204   :  { %239 = vsyncpa [#allocation8], 1 }
 0x205   :  { %240 = vsyncpa [#allocation9], 1 }
 0x206   :  { %241 = vsyncmov [#allocation3] }
 0x209   :  { %s242_s28 = vpop.sfrf %241 }
 0x20a   :  { %p327_p12 = scmp.ne.s32.totalorder %s242_s28, 0 }
 0x20c   :  { %246 = shalt.err (%p327_p12)  }
 0x20d   :  { %248 = vsyncmov [#allocation3 + $0x1] }
 0x210   :  { %s249_s30 = vpop.sfrf %248 }
 0x211   :  { %p328_p13 = scmp.ne.s32.totalorder %s249_s30, 0 }
 0x213   :  { %253 = shalt.err (%p328_p13)  }
 0x214   :  { %255 = vsyncmov [#allocation3 + $0x2] }
 0x217   :  { %s256_s0 = vpop.sfrf %255 }
 0x218   :  { %p329_p0 = scmp.ne.s32.totalorder %s256_s0, 0 }
 0x21a   :  { %260 = shalt.err (%p329_p0)  }
 0x21b   :  { %262 = vsyncmov [#allocation3 + $0x3] }
 0x21e   :  { %s263_s4 = vpop.sfrf %262 }
 0x21f   :  { %p330_p1 = scmp.ne.s32.totalorder %s263_s4, 0 }
 0x221   :  { %267 = shalt.err (%p330_p1)  }
 0x222   :  { %269 = vsyncmov [#allocation3 + $0x4] }
 0x225   :  { %s270_s3 = vpop.sfrf %269 }
 0x226   :  { %p331_p2 = scmp.ne.s32.totalorder %s270_s3, 0 }
 0x228   :  { %274 = shalt.err (%p331_p2)  }
 0x229   :  { %276 = vsyncmov [#allocation3 + $0x5] }
 0x22c   :  { %s277_s6 = vpop.sfrf %276 }
 0x22d   :  { %p332_p3 = scmp.ne.s32.totalorder %s277_s6, 0 }
 0x22f   :  { %281 = shalt.err (%p332_p3)  }
 0x230   :  { %283 = vsyncmov [#allocation3 + $0x6] }
 0x233   :  { %s284_s7 = vpop.sfrf %283 }
 0x234   :  { %p333_p4 = scmp.ne.s32.totalorder %s284_s7, 0 }
 0x236   :  { %288 = shalt.err (%p333_p4)  }
 0x237   :  { %290 = vsyncmov [#allocation3 + $0x7] }
 0x23a   :  { %s291_s12 = vpop.sfrf %290 }
 0x23b   :  { %p334_p5 = scmp.ne.s32.totalorder %s291_s12, 0 }
 0x23d   :  { %295 = shalt.err (%p334_p5)  }

</bundles_post_ra>
